<compile_context>
chip_gen: v7x
topology: tpu7x:2x2x1
jax: 0.10.0
libtpu: 0.0.40
codegen_flags: <defaults>
</compile_context>

<pallas_src>
import functools

import jax
import jax.numpy as jnp
from jax.experimental import pallas as pl
from jax.experimental.pallas import tpu as pltpu


def mlp_kernel(x_ref, w1_ref, b1_ref, w2_ref, b2_ref, w3_ref, b3_ref, o_ref):
    # x arrives f32; cast to bf16 in-kernel (saves a wrapper-side XLA launch).
    x = x_ref[...].astype(jnp.bfloat16)
    # fc1 + relu  (bf16 MXU inputs, f32 accumulation / bias / activation)
    h1 = jnp.dot(x, w1_ref[...], preferred_element_type=jnp.float32)
    h1 = jnp.maximum(h1 + b1_ref[...], 0.0)
    # fc2 + relu
    h2 = jnp.dot(h1.astype(jnp.bfloat16), w2_ref[...],
                 preferred_element_type=jnp.float32)
    h2 = jnp.maximum(h2 + b2_ref[...], 0.0)
    # fc3 (no activation); lane-dense [tb, 128] slab, stored bf16 to halve writeback
    out = jnp.dot(h2.astype(jnp.bfloat16), w3_ref[...],
                  preferred_element_type=jnp.float32) + b3_ref[...]
    o_ref[...] = out.astype(o_ref.dtype)


def prepare_params(params):
    """One-time parameter prep (hoisted out of the per-call forward):
    bf16 weights, f32 biases, fc3 padded to a 128-lane-dense output slab.
    Returns (prepped_params, out_dim)."""
    w1, b1, w2, b2, w3, b3 = params
    out_dim = w3.shape[1]
    out_pad = 128 * pl.cdiv(out_dim, 128)
    w3p = jnp.zeros((w3.shape[0], out_pad), w3.dtype).at[:, :out_dim].set(w3)
    b3p = jnp.zeros((1, out_pad), b3.dtype).at[:, :out_dim].set(b3)
    prepped = (
        w1.astype(jnp.bfloat16), b1.astype(jnp.float32),
        w2.astype(jnp.bfloat16), b2.astype(jnp.float32),
        w3p.astype(jnp.bfloat16), b3p.astype(jnp.float32),
    )
    return prepped, out_dim


@functools.partial(jax.jit, static_argnames=("out_dim", "tb"))
def simple_network_forward(x, prepped, *, out_dim, tb=None):
    w1b, b1f, w2b, b2f, w3b, b3f = prepped
    B, in_dim = x.shape
    out_pad = w3b.shape[1]

    # --- batch tile: 16-aligned (bf16 sublane packing), up to 2048 rows;
    #     at moderate/large batch force >= 2 grid steps so the "parallel"
    #     batch axis can shard across v7x's two TensorCores.
    if tb is None:
        cap = 2048
        b16 = 16 * pl.cdiv(B, 16)
        if b16 <= 32 or b16 > 2 * cap:
            tb = min(cap, b16)
        else:
            tb = 16 * pl.cdiv(pl.cdiv(b16, 2), 16)
    b_pad = tb * pl.cdiv(B, tb)

    # Pad only the tail tile rather than re-materializing all of x.
    if b_pad == B:
        x_p = x
    else:
        x_p = jnp.concatenate(
            [x, jnp.zeros((b_pad - B, in_dim), x.dtype)], axis=0)

    # Weights/biases: constant block index -> fetched once, VMEM-resident.
    resident = lambda a: pl.BlockSpec(a.shape, lambda i: (0,) * a.ndim)

    out_p = pl.pallas_call(
        mlp_kernel,
        out_shape=jax.ShapeDtypeStruct((b_pad, out_pad), jnp.bfloat16),
        grid=(b_pad // tb,),
        in_specs=[
            pl.BlockSpec((tb, in_dim), lambda i: (i, 0)),   # x tile, pipelined
            resident(w1b), resident(b1f),
            resident(w2b), resident(b2f),
            resident(w3b), resident(b3f),
        ],
        out_specs=pl.BlockSpec((tb, out_pad), lambda i: (i, 0)),
        compiler_params=pltpu.CompilerParams(
            dimension_semantics=("parallel",)),
    )(x_p, w1b, b1f, w2b, b2f, w3b, b3f)

    return out_p[:B, :out_dim].astype(jnp.float32)


def init_params(key, input_size=6, fc1_dims=256, fc2_dims=256, output=20):
    """Deterministic init mimicking PyTorch Linear default (uniform +-1/sqrt(fan_in))."""
    ks = jax.random.split(key, 6)

    def layer(kw, kb, fan_in, fan_out):
        bound = 1.0 / jnp.sqrt(fan_in)
        w = jax.random.uniform(kw, (fan_in, fan_out), jnp.float32, -bound, bound)
        b = jax.random.uniform(kb, (1, fan_out), jnp.float32, -bound, bound)
        return w, b

    w1, b1 = layer(ks[0], ks[1], input_size, fc1_dims)
    w2, b2 = layer(ks[2], ks[3], fc1_dims, fc2_dims)
    w3, b3 = layer(ks[4], ks[5], fc2_dims, output)
    return (w1, b1, w2, b2, w3, b3)


if __name__ == "__main__":
    key = jax.random.PRNGKey(0)
    k_x, k_p = jax.random.split(key)

    B, input_size = 8, 6
    x = jax.random.normal(k_x, (B, input_size), jnp.float32)
    params = init_params(k_p, input_size=input_size, fc1_dims=256,
                         fc2_dims=256, output=20)

    # One-time weight prep, then the (jitted) forward.
    prepped, out_dim = prepare_params(params)
    out = simple_network_forward(x, prepped, out_dim=out_dim)
    out = jax.block_until_ready(out)
    assert out.shape == (B, 20)
    assert out.dtype == jnp.float32

    w1, b1, w2, b2, w3, b3 = params

    # bf16-consistent reference (same casting scheme as the kernel) -> tight check
    xb = x.astype(jnp.bfloat16)
    h = jnp.maximum(jnp.dot(xb, w1.astype(jnp.bfloat16),
                            preferred_element_type=jnp.float32) + b1, 0.0)
    h = jnp.maximum(jnp.dot(h.astype(jnp.bfloat16), w2.astype(jnp.bfloat16),
                            preferred_element_type=jnp.float32) + b2, 0.0)
    ref = jnp.dot(h.astype(jnp.bfloat16), w3.astype(jnp.bfloat16),
                  preferred_element_type=jnp.float32) + b3
    ref_bf16 = ref.astype(jnp.bfloat16).astype(jnp.float32)  # match bf16 output store
    assert jnp.allclose(out, ref_bf16, atol=1e-2, rtol=1e-2)

    # pure-f32 reference -> loose check (bf16 quantization error budget)
    ref_f32 = jnp.maximum(x @ w1 + b1, 0.0)
    ref_f32 = jnp.maximum(ref_f32 @ w2 + b2, 0.0)
    ref_f32 = ref_f32 @ w3 + b3
    assert jnp.allclose(out, ref_f32, atol=5e-2, rtol=5e-2)

    print("KERNEL_OK")
</pallas_src>

<mosaic_0001>
module attributes {stable_mosaic.version = 11 : i64} {
  func.func @mlp_kernel(%arg0: i32, %arg1: memref<16x6xf32, #tpu.memory_space<vmem>>, %arg2: memref<6x256xbf16, #tpu.memory_space<vmem>>, %arg3: memref<1x256xf32, #tpu.memory_space<vmem>>, %arg4: memref<256x256xbf16, #tpu.memory_space<vmem>>, %arg5: memref<1x256xf32, #tpu.memory_space<vmem>>, %arg6: memref<256x128xbf16, #tpu.memory_space<vmem>>, %arg7: memref<1x128xf32, #tpu.memory_space<vmem>>, %arg8: memref<16x128xbf16, #tpu.memory_space<vmem>>) attributes {dimension_semantics = [#tpu.dimension_semantics<parallel>], iteration_bounds = array<i64: 1>, scalar_prefetch = 0 : i64, scratch_operands = 0 : i64, tpu.core_type = #tpu.core_type<tc>, window_params = [{transform_indices = @transform_0, window_bounds = array<i64: 16, 6>}, {pipeline_mode = #tpu.pipeline_mode<synchronous>, transform_indices = @transform_1, window_bounds = array<i64: 6, 256>}, {pipeline_mode = #tpu.pipeline_mode<synchronous>, transform_indices = @transform_2, window_bounds = array<i64: 1, 256>}, {pipeline_mode = #tpu.pipeline_mode<synchronous>, transform_indices = @transform_3, window_bounds = array<i64: 256, 256>}, {pipeline_mode = #tpu.pipeline_mode<synchronous>, transform_indices = @transform_4, window_bounds = array<i64: 1, 256>}, {pipeline_mode = #tpu.pipeline_mode<synchronous>, transform_indices = @transform_5, window_bounds = array<i64: 256, 128>}, {pipeline_mode = #tpu.pipeline_mode<synchronous>, transform_indices = @transform_6, window_bounds = array<i64: 1, 128>}, {transform_indices = @transform_7, window_bounds = array<i64: 16, 128>}]} {
    %c0 = arith.constant 0 : index
    %c0_0 = arith.constant 0 : index
    %0 = vector.load %arg1[%c0, %c0_0] : memref<16x6xf32, #tpu.memory_space<vmem>>, vector<16x6xf32>
    %1 = arith.truncf %0 : vector<16x6xf32> to vector<16x6xbf16>
    %c0_1 = arith.constant 0 : index
    %c0_2 = arith.constant 0 : index
    %2 = vector.load %arg2[%c0_1, %c0_2] : memref<6x256xbf16, #tpu.memory_space<vmem>>, vector<6x256xbf16>
    %cst = arith.constant dense<0.000000e+00> : vector<16x256xf32>
    %3 = tpu.matmul %1, %2, %cst {dimension_numbers = #tpu.dot_dimension_numbers<[1], [0], [0], [1], [0, 0, 1, 1], [], []>} : vector<16x6xbf16>, vector<6x256xbf16>, vector<16x256xf32> -> vector<16x256xf32>
    %c0_3 = arith.constant 0 : index
    %c0_4 = arith.constant 0 : index
    %4 = vector.load %arg3[%c0_3, %c0_4] : memref<1x256xf32, #tpu.memory_space<vmem>>, vector<1x256xf32>
    %5 = vector.broadcast %4 : vector<1x256xf32> to vector<16x256xf32>
    %6 = arith.addf %3, %5 : vector<16x256xf32>
    %cst_5 = arith.constant 0.000000e+00 : f32
    %7 = vector.broadcast %cst_5 : f32 to vector<16x256xf32>
    %8 = arith.maximumf %6, %7 : vector<16x256xf32>
    %9 = arith.truncf %8 : vector<16x256xf32> to vector<16x256xbf16>
    %c0_6 = arith.constant 0 : index
    %c0_7 = arith.constant 0 : index
    %10 = vector.load %arg4[%c0_6, %c0_7] : memref<256x256xbf16, #tpu.memory_space<vmem>>, vector<256x256xbf16>
    %cst_8 = arith.constant dense<0.000000e+00> : vector<16x256xf32>
    %11 = tpu.matmul %9, %10, %cst_8 {dimension_numbers = #tpu.dot_dimension_numbers<[1], [0], [0], [1], [0, 0, 1, 1], [], []>} : vector<16x256xbf16>, vector<256x256xbf16>, vector<16x256xf32> -> vector<16x256xf32>
    %c0_9 = arith.constant 0 : index
    %c0_10 = arith.constant 0 : index
    %12 = vector.load %arg5[%c0_9, %c0_10] : memref<1x256xf32, #tpu.memory_space<vmem>>, vector<1x256xf32>
    %13 = vector.broadcast %12 : vector<1x256xf32> to vector<16x256xf32>
    %14 = arith.addf %11, %13 : vector<16x256xf32>
    %cst_11 = arith.constant 0.000000e+00 : f32
    %15 = vector.broadcast %cst_11 : f32 to vector<16x256xf32>
    %16 = arith.maximumf %14, %15 : vector<16x256xf32>
    %17 = arith.truncf %16 : vector<16x256xf32> to vector<16x256xbf16>
    %c0_12 = arith.constant 0 : index
    %c0_13 = arith.constant 0 : index
    %18 = vector.load %arg6[%c0_12, %c0_13] : memref<256x128xbf16, #tpu.memory_space<vmem>>, vector<256x128xbf16>
    %cst_14 = arith.constant dense<0.000000e+00> : vector<16x128xf32>
    %19 = tpu.matmul %17, %18, %cst_14 {dimension_numbers = #tpu.dot_dimension_numbers<[1], [0], [0], [1], [0, 0, 1, 1], [], []>} : vector<16x256xbf16>, vector<256x128xbf16>, vector<16x128xf32> -> vector<16x128xf32>
    %c0_15 = arith.constant 0 : index
    %c0_16 = arith.constant 0 : index
    %20 = vector.load %arg7[%c0_15, %c0_16] : memref<1x128xf32, #tpu.memory_space<vmem>>, vector<1x128xf32>
    %21 = vector.broadcast %20 : vector<1x128xf32> to vector<16x128xf32>
    %22 = arith.addf %19, %21 : vector<16x128xf32>
    %23 = arith.truncf %22 : vector<16x128xf32> to vector<16x128xbf16>
    %c0_17 = arith.constant 0 : index
    %c0_18 = arith.constant 0 : index
    %24 = vector.load %arg8[%c0_17, %c0_18] : memref<16x128xbf16, #tpu.memory_space<vmem>>, vector<16x128xbf16>
    tpu.vector_store %arg8[%c0_17, %c0_18], %23 {strides = array<i32>} : memref<16x128xbf16, #tpu.memory_space<vmem>>, vector<16x128xbf16>,
    return
  }
  func.func @transform_0(%arg0: i32) -> (i32, i32) {
    %c0_i32 = arith.constant 0 : i32
    %c0_i32_0 = arith.constant 0 : i32
    return %arg0, %c0_i32 : i32, i32
  }
  func.func @transform_1(%arg0: i32) -> (i32, i32) {
    %c0_i32 = arith.constant 0 : i32
    %c0_i32_0 = arith.constant 0 : i32
    %c0_i32_1 = arith.constant 0 : i32
    return %c0_i32, %c0_i32_0 : i32, i32
  }
  func.func @transform_2(%arg0: i32) -> (i32, i32) {
    %c0_i32 = arith.constant 0 : i32
    %c0_i32_0 = arith.constant 0 : i32
    %c0_i32_1 = arith.constant 0 : i32
    return %c0_i32, %c0_i32_0 : i32, i32
  }
  func.func @transform_3(%arg0: i32) -> (i32, i32) {
    %c0_i32 = arith.constant 0 : i32
    %c0_i32_0 = arith.constant 0 : i32
    %c0_i32_1 = arith.constant 0 : i32
    return %c0_i32, %c0_i32_0 : i32, i32
  }
  func.func @transform_4(%arg0: i32) -> (i32, i32) {
    %c0_i32 = arith.constant 0 : i32
    %c0_i32_0 = arith.constant 0 : i32
    %c0_i32_1 = arith.constant 0 : i32
    return %c0_i32, %c0_i32_0 : i32, i32
  }
  func.func @transform_5(%arg0: i32) -> (i32, i32) {
    %c0_i32 = arith.constant 0 : i32
    %c0_i32_0 = arith.constant 0 : i32
    %c0_i32_1 = arith.constant 0 : i32
    return %c0_i32, %c0_i32_0 : i32, i32
  }
  func.func @transform_6(%arg0: i32) -> (i32, i32) {
    %c0_i32 = arith.constant 0 : i32
    %c0_i32_0 = arith.constant 0 : i32
    %c0_i32_1 = arith.constant 0 : i32
    return %c0_i32, %c0_i32_0 : i32, i32
  }
  func.func @transform_7(%arg0: i32) -> (i32, i32) {
    %c0_i32 = arith.constant 0 : i32
    %c0_i32_0 = arith.constant 0 : i32
    return %arg0, %c0_i32 : i32, i32
  }
}

</mosaic_0001>

<bundles_post_ra>
// kernel: simple_network_forward.1
= control target key start
LH: loop header
LB: loop body
LE: loop exit
PB: predicated region body
PF: predicated region fallthrough
CT: control target
= control target key end

     0   :  { %12 = vsyncpa [#allocation3], 0  ;;  %s878_s0 = inlined_call_operand.vmem [shape: f32[16,6], index: 0, kind: input, shape index: {}]   ;;  %s879_s1 = inlined_call_operand.vmem [shape: bf16[6,256], index: 1, kind: input, shape index: {}]   ;;  %s880_s2 = inlined_call_operand.vmem [shape: f32[1,256], index: 2, kind: input, shape index: {}]   ;;  %s881_s3 = inlined_call_operand.hbm [shape: bf16[256,256], index: 3, kind: input, shape index: {}]   ;;  %s882_s4 = inlined_call_operand.vmem [shape: f32[1,256], index: 4, kind: input, shape index: {}]   ;;  %s883_s5 = inlined_call_operand.hbm [shape: bf16[256,128], index: 5, kind: input, shape index: {}]   ;;  %s884_s6 = inlined_call_operand.vmem [shape: f32[1,128], index: 6, kind: input, shape index: {}]   ;;  %s885_s7 = inlined_call_operand.vmem [shape: bf16[16,128], index: 7, kind: output, shape index: {}]  }
   0x1   :  { %13 = vsyncpa [#allocation5], 0  ;;  %s786_s24 = smov [#allocation2]   ;;  %s738_s28 = scalar_lea.hbm %s881_s3, 4096 }
   0x2   :  { %s25_s25 = sshll.u32 %s786_s24, 4  ;;  %p739_p0 = scmp.ne.s32.totalorder %s881_s3, %s738_s28  ;;  %s26_s25 = int_to_ptr.vmem [resolvable:$true] %s25_s25 }
   0x3   :  { %p742_p1 = scmp.lt.u32.totalorder %s738_s28, %s881_s3 }
   0x5   :  { %p744_p2 = pnand %p742_p1, %p739_p0 }
   0x7   :  { %747 = shalt.err (!%p744_p2)
}
   0x8   :  { %s748_s10 = scalar_lea.vmem %s26_s25, 4096  ;;  %p753_p4 = scmp.lt.s32.totalorder %s26_s25, %s26_s25 }
   0x9   :  { %p749_p3 = scmp.ne.s32.totalorder %s26_s25, %s748_s10  ;;  %p754_p5 = scmp.lt.s32.totalorder %s748_s10, %s748_s10 }
   0xb   :  { %p755_p6 = por %p754_p5, %p753_p4 }
   0xd   :  { %p756_p7 = pnand %p755_p6, %p749_p3 }
   0xf   :  { %759 = shalt.err (!%p756_p7)
}
  0x10   :  { %s787_s11 = smov 128   ;;  %s788_s12 = smov 8  }
  0x11   :  { %31 = dma.hbm_to_vmem [thread:$0]  %s881_s3, 4096, %s26_s25, [#allocation3], %s787_s11, %s787_s11, %s788_s12  }
  0x12   :  { %s789_s15 = smov [#allocation4]   ;;  %s760_s19 = scalar_lea.hbm %s883_s5, 2048 }
  0x13   :  { %s39_s16 = sshll.u32 %s789_s15, 4  ;;  %p761_p8 = scmp.ne.s32.totalorder %s883_s5, %s760_s19  ;;  %s40_s16 = int_to_ptr.vmem [resolvable:$true] %s39_s16 }
  0x14   :  { %p764_p9 = scmp.lt.u32.totalorder %s760_s19, %s883_s5 }
  0x16   :  { %p766_p10 = pnand %p764_p9, %p761_p8 }
  0x18   :  { %769 = shalt.err (!%p766_p10)
}
  0x19   :  { %s770_s24 = scalar_lea.vmem %s40_s16, 2048  ;;  %p775_p12 = scmp.lt.s32.totalorder %s40_s16, %s40_s16 }
  0x1a   :  { %p771_p11 = scmp.ne.s32.totalorder %s40_s16, %s770_s24  ;;  %p776_p13 = scmp.lt.s32.totalorder %s770_s24, %s770_s24 }
  0x1c   :  { %p777_p0 = por %p776_p13, %p775_p12 }
  0x1e   :  { %p778_p1 = pnand %p777_p0, %p771_p11 }
  0x20   :  { %781 = shalt.err (!%p778_p1)
}
  0x21   :  { %s790_s3 = smov 64   ;;  %s791_s25 = smov 4  }
  0x22   :  { %45 = dma.hbm_to_vmem [thread:$0]  %s883_s5, 2048, %s40_s16, [#allocation5], %s790_s3, %s790_s3, %s791_s25  }
  0x23   :  { %782 = dma.done.wait [#allocation3], 4096  }
  0x24   :  { %783 = vsyncadd [#allocation3], 4294963200 }
  0x25   :  { %784 = dma.done.wait [#allocation5], 2048  }
  0x26   :  { %785 = vsyncadd [#allocation5], 4294965248  ;;  %v792_v0 = vmov 0   ;;  %v58_v1 = vld [vmem:[%s879_s1] sm:$0x77]  ;;  %vm80_vm0 = vcmask 1042432   ;;  %v61_v51 = vlaneseq }
  0x27   :  { %119 = vmatprep.mubr.bf16.mxu0 %v792_v0  ;;  %v55_v2 = vld [vmem:[%s878_s0] sm:$0xff]  ;;  %v56_v3 = vld [vmem:[%s878_s0 + $0x8] sm:$0xff]  ;;  %v582_v4 = vcombine.high %v58_v1, %v58_v1  ;;  %v581_v5 = vcombine.low %v58_v1, %v58_v1  ;;  %v677_v10 = vld [vmem:[#allocation2 + $0x14] ss:$8 sps:$4 sm:$0xff]   ;;  %vm76_vm1 = vcmask 48128  }
  0x28   :  { %v674_v6 = vld [vmem:[#allocation2 + $0x4] ss:$8 sps:$4 sm:$0xff]   ;;  %v676_v7 = vld [vmem:[#allocation2] ss:$8 sps:$4 sm:$0xff]   ;;  %v57_v9 = vpack.c.bf16 %v56_v3, %v55_v2  ;;  %v679_v11 = vld [vmem:[#allocation2 + $0x10] ss:$8 sps:$4 sm:$0xff]  }
  0x29   :  { %583 = vmatprep.subr.msk.bf16.mxu0 %vm80_vm0, %v582_v4  ;;  %v82_v8 = vsel %vm80_vm0, %v581_v5, 0  ;;  %340 = vmatprep.subr.bf16.mxu1 %v674_v6  ;;  %v680_v12 = vld [vmem:[#allocation2 + $0x24] ss:$8 sps:$4 sm:$0xff]   ;;  %v682_v13 = vld [vmem:[#allocation2 + $0x20] ss:$8 sps:$4 sm:$0xff]   ;;  %v726_v44 = vld [vmem:[#allocation4 + $0x50] sm:$0xff]  }
  0x2a   :  { %88 = vmatpush1.bf16.msra.mxu0 %v82_v8  ;;  %341 = vmatpush1.bf16.msra.mxu1 %v676_v7  ;;  %v683_v14 = vld [vmem:[#allocation2 + $0x34] ss:$8 sps:$4 sm:$0xff]   ;;  %v685_v15 = vld [vmem:[#allocation2 + $0x30] ss:$8 sps:$4 sm:$0xff]   ;;  %v686_v16 = vld [vmem:[#allocation2 + $0x44] ss:$8 sps:$4 sm:$0xff]  }
  0x2b   :  { %342 = vmatprep.subr.bf16.mxu1 %v677_v10  ;;  %v688_v17 = vld [vmem:[#allocation2 + $0x40] ss:$8 sps:$4 sm:$0xff]   ;;  %v689_v18 = vld [vmem:[#allocation2 + $0x54] ss:$8 sps:$4 sm:$0xff]   ;;  %v691_v19 = vld [vmem:[#allocation2 + $0x50] ss:$8 sps:$4 sm:$0xff]  }
  0x2c   :  { %v692_v20 = vld [vmem:[#allocation2 + $0x64] ss:$8 sps:$4 sm:$0xff]   ;;  %v694_v21 = vld [vmem:[#allocation2 + $0x60] ss:$8 sps:$4 sm:$0xff]   ;;  %v695_v22 = vld [vmem:[#allocation2 + $0x74] ss:$8 sps:$4 sm:$0xff]  }
  0x2d   :  { %584 = vmatmul.mubr.msk.bf16.vlgmr.msra.gmra.mrb[0].mxu0 %vm76_vm1, %v57_v9  ;;  %v697_v23 = vld [vmem:[#allocation2 + $0x70] ss:$8 sps:$4 sm:$0xff]   ;;  %v698_v24 = vld [vmem:[#allocation2 + $0x84] ss:$8 sps:$4 sm:$0xff]   ;;  %v700_v25 = vld [vmem:[#allocation2 + $0x80] ss:$8 sps:$4 sm:$0xff]  }
  0x2e   :  { %343 = vmatpush1.bf16.msra.mxu1 %v679_v11  ;;  %v701_v26 = vld [vmem:[#allocation2 + $0x94] ss:$8 sps:$4 sm:$0xff]   ;;  %v703_v27 = vld [vmem:[#allocation2 + $0x90] ss:$8 sps:$4 sm:$0xff]   ;;  %v704_v28 = vld [vmem:[#allocation2 + $0xa4] ss:$8 sps:$4 sm:$0xff]  }
  0x2f   :  { %344 = vmatprep.subr.bf16.mxu1 %v680_v12  ;;  %v706_v29 = vld [vmem:[#allocation2 + $0xa0] ss:$8 sps:$4 sm:$0xff]   ;;  %v707_v30 = vld [vmem:[#allocation2 + $0xb4] ss:$8 sps:$4 sm:$0xff]   ;;  %v709_v31 = vld [vmem:[#allocation2 + $0xb0] ss:$8 sps:$4 sm:$0xff]  }
  0x30   :  { %v710_v32 = vld [vmem:[#allocation2 + $0xc4] ss:$8 sps:$4 sm:$0xff]   ;;  %v712_v33 = vld [vmem:[#allocation2 + $0xc0] ss:$8 sps:$4 sm:$0xff]   ;;  %v713_v34 = vld [vmem:[#allocation2 + $0xd4] ss:$8 sps:$4 sm:$0xff]  }
  0x31   :  { %v715_v35 = vld [vmem:[#allocation2 + $0xd0] ss:$8 sps:$4 sm:$0xff]   ;;  %v716_v36 = vld [vmem:[#allocation2 + $0xe4] ss:$8 sps:$4 sm:$0xff]   ;;  %v718_v37 = vld [vmem:[#allocation2 + $0xe0] ss:$8 sps:$4 sm:$0xff]  }
  0x32   :  { %345 = vmatpush1.bf16.msra.mxu1 %v682_v13  ;;  %v719_v38 = vld [vmem:[#allocation2 + $0xf4] ss:$8 sps:$4 sm:$0xff]   ;;  %v721_v39 = vld [vmem:[#allocation2 + $0xf0] ss:$8 sps:$4 sm:$0xff]   ;;  %v722_v40 = vld [vmem:[#allocation4 + $0x40] sm:$0xff]   ;;  %v62_v52 = vshrl.u32 %v61_v51, 7 }
  0x33   :  { %346 = vmatprep.subr.bf16.mxu1 %v683_v14  ;;  %v723_v41 = vld [vmem:[#allocation4] sm:$0xff]   ;;  %v724_v42 = vld [vmem:[#allocation4 + $0x48] sm:$0xff]   ;;  %643 = vmatprep.subr.bf16.mxu0 %v722_v40  ;;  %v727_v45 = vld [vmem:[#allocation4 + $0x10] sm:$0xff]  }
  0x34   :  { %644 = vmatpush3.bf16.msra.mxu0 %v723_v41  ;;  %v725_v43 = vld [vmem:[#allocation4 + $0x8] sm:$0xff]   ;;  %v728_v46 = vld [vmem:[#allocation4 + $0x58] sm:$0xff]   ;;  %v730_v48 = vld [vmem:[#allocation4 + $0x60] sm:$0xff]   ;;  %v63_v53 = vsub.s32 0, %v62_v52  ;;  %v67_v55 = vsub.s32 1, %v62_v52 }
  0x35   :  { %645 = vmatprep.subr.bf16.mxu0 %v724_v42  ;;  %v729_v47 = vld [vmem:[#allocation4 + $0x18] sm:$0xff]   ;;  %v731_v49 = vld [vmem:[#allocation4 + $0x20] sm:$0xff]   ;;  %v732_v50 = vld [vmem:[#allocation4 + $0x68] sm:$0xff]  }
  0x36   :  { %347 = vmatpush1.bf16.msra.mxu1 %v685_v15  ;;  %v59_v54 = vld [vmem:[%s880_s2] sm:$0x3]  ;;  %v733_v8 = vld [vmem:[#allocation4 + $0x28] sm:$0xff]   ;;  %v734_v9 = vld [vmem:[#allocation4 + $0x70] sm:$0xff]  }
  0x37   :  { %348 = vmatprep.subr.bf16.mxu1 %v686_v16  ;;  %v64_v56 = vrot.slane %v59_v54, %v63_v53  ;;  %v68_v57 = vrot.slane %v59_v54, %v67_v55  ;;  %v735_v10 = vld [vmem:[#allocation4 + $0x30] sm:$0xff]   ;;  %v736_v11 = vld [vmem:[#allocation4 + $0x78] sm:$0xff]   ;;  %v168_v13 = vld [vmem:[%s882_s4] sm:$0x3] }
  0x38   :  { %646 = vmatpush3.bf16.msra.mxu0 %v725_v43  ;;  %v737_v12 = vld [vmem:[#allocation4 + $0x38] sm:$0xff]   ;;  %v173_v14 = vrot.slane %v168_v13, %v63_v53  ;;  %v177_v15 = vrot.slane %v168_v13, %v67_v55 }
  0x39   :  { %647 = vmatprep.subr.bf16.mxu0 %v726_v44 }
  0x3a   :  { %349 = vmatpush1.bf16.msra.mxu1 %v688_v17 }
  0x3b   :  { %350 = vmatprep.subr.bf16.mxu1 %v689_v18 }
  0x3c   :  { %648 = vmatpush3.bf16.msra.mxu0 %v727_v45 }
  0x3d   :  { %649 = vmatprep.subr.bf16.mxu0 %v728_v46 }
  0x3e   :  { %351 = vmatpush1.bf16.msra.mxu1 %v691_v19 }
  0x3f   :  { %352 = vmatprep.subr.bf16.mxu1 %v692_v20 }
  0x40   :  { %650 = vmatpush3.bf16.msra.mxu0 %v729_v47 }
  0x41   :  { %651 = vmatprep.subr.bf16.mxu0 %v730_v48 }
  0x42   :  { %353 = vmatpush1.bf16.msra.mxu1 %v694_v21 }
  0x43   :  { %354 = vmatprep.subr.bf16.mxu1 %v695_v22 }
  0x44   :  { %652 = vmatpush3.bf16.msra.mxu0 %v731_v49 }
  0x45   :  { %653 = vmatprep.subr.bf16.mxu0 %v732_v50 }
  0x46   :  { %355 = vmatpush1.bf16.msra.mxu1 %v697_v23 }
  0x47   :  { %356 = vmatprep.subr.bf16.mxu1 %v698_v24 }
  0x48   :  { %654 = vmatpush3.bf16.msra.mxu0 %v733_v8 }
  0x49   :  { %655 = vmatprep.subr.bf16.mxu0 %v734_v9 }
  0x4a   :  { %357 = vmatpush1.bf16.msra.mxu1 %v700_v25 }
  0x4b   :  { %358 = vmatprep.subr.bf16.mxu1 %v701_v26 }
  0x4c   :  { %656 = vmatpush3.bf16.msra.mxu0 %v735_v10 }
  0x4d   :  { %657 = vmatprep.subr.bf16.mxu0 %v736_v11 }
  0x4e   :  { %359 = vmatpush1.bf16.msra.mxu1 %v703_v27 }
  0x4f   :  { %360 = vmatprep.subr.bf16.mxu1 %v704_v28 }
  0x50   :  { %658 = vmatpush3.bf16.msra.mxu0 %v737_v12 }
  0x52   :  { %361 = vmatpush1.bf16.msra.mxu1 %v706_v29 }
  0x53   :  { %362 = vmatprep.subr.bf16.mxu1 %v707_v30 }
  0x56   :  { %363 = vmatpush1.bf16.msra.mxu1 %v709_v31 }
  0x57   :  { %364 = vmatprep.subr.bf16.mxu1 %v710_v32 }
  0x5a   :  { %365 = vmatpush1.bf16.msra.mxu1 %v712_v33 }
  0x5b   :  { %366 = vmatprep.subr.bf16.mxu1 %v713_v34  ;;  %v617_v34 = vld [vmem:[%s884_s6] ss:$0 sm:$0xff] }
  0x5e   :  { %367 = vmatpush1.bf16.msra.mxu1 %v715_v35 }
  0x5f   :  { %368 = vmatprep.subr.bf16.mxu1 %v716_v36 }
  0x62   :  { %369 = vmatpush1.bf16.msra.mxu1 %v718_v37 }
  0x63   :  { %370 = vmatprep.subr.bf16.mxu1 %v719_v38 }
  0x66   :  { %371 = vmatpush1.bf16.msra.mxu1 %v721_v39 }
 0x100   :  { %v121_v58 = vpop.f32.mrb[0].mxu0 }
 0x101   :  { %v122_v59 = vadd.f32 %v121_v58, %v64_v56  ;;  %v123_v60 = vpop.f32.mrb[1].mxu0 }
 0x102   :  { %v124_v61 = vadd.f32 %v123_v60, %v68_v57  ;;  %v125_v62 = vpop.f32.mrb[2].mxu0 }
 0x103   :  { %v126_v63 = vadd.f32 %v125_v62, %v64_v56  ;;  %v127_v0 = vpop.f32.mrb[3].mxu0  ;;  %v130_v2 = vmax.f32 %v122_v59, 0.0 }
 0x104   :  { %v128_v1 = vadd.f32 %v127_v0, %v68_v57  ;;  %v131_v4 = vmax.f32 %v124_v61, 0.0 }
 0x105   :  { %v132_v3 = vmax.f32 %v126_v63, 0.0 }
 0x106   :  { %v133_v5 = vmax.f32 %v128_v1, 0.0 }
 0x107   :  { %v134_v6 = vpack.c.bf16 %v132_v3, %v130_v2 }
 0x108   :  { %v135_v7 = vpack.c.bf16 %v133_v5, %v131_v4 }
 0x10a   :  { %372 = vmatprep.mubr.bf16.mxu1 %v135_v7 }
 0x10b   :  { %373 = vmatmul.mubr.bf16.vlgmr.msra.gmra.mrb[0].mxu1 %v134_v6 }
 0x1de   :  { %v374_v16 = vpop.f32.mrb[0].mxu1 }
 0x1df   :  { %v375_v17 = vadd.f32 %v374_v16, %v173_v14  ;;  %v376_v18 = vpop.f32.mrb[1].mxu1 }
 0x1e0   :  { %v377_v19 = vadd.f32 %v376_v18, %v177_v15  ;;  %v378_v20 = vpop.f32.mrb[2].mxu1 }
 0x1e1   :  { %v379_v21 = vadd.f32 %v378_v20, %v173_v14  ;;  %v380_v22 = vpop.f32.mrb[3].mxu1  ;;  %v383_v24 = vmax.f32 %v375_v17, 0.0 }
 0x1e2   :  { %v381_v23 = vadd.f32 %v380_v22, %v177_v15  ;;  %v384_v26 = vmax.f32 %v377_v19, 0.0 }
 0x1e3   :  { %v385_v25 = vmax.f32 %v379_v21, 0.0 }
 0x1e4   :  { %v386_v27 = vmax.f32 %v381_v23, 0.0 }
 0x1e5   :  { %v387_v28 = vpack.c.bf16 %v385_v25, %v383_v24 }
 0x1e6   :  { %v388_v29 = vpack.c.bf16 %v386_v27, %v384_v26 }
 0x1e8   :  { %556 = vmatprep.mubr.bf16.mxu0 %v388_v29 }
 0x1e9   :  { %557 = vmatmul.mubr.bf16.vlgmr.msra.gmra.mrb[4].mxu0 %v387_v28 }
 0x2bc   :  { %v659_v30 = vpop.f32.mrb[4].mxu0 }
 0x2bd   :  { %v660_v31 = vpop.f32.mrb[5].mxu0 }
 0x2be   :  { %v661_v32 = vadd.f32 %v660_v31, %v659_v30  ;;  %v662_v33 = vpop.f32.mrb[6].mxu0 }
 0x2bf   :  { %v663_v35 = vpop.f32.mrb[7].mxu0 }
 0x2c0   :  { %v664_v36 = vadd.f32 %v663_v35, %v662_v33  ;;  %v559_v37 = vadd.f32 %v661_v32, %v617_v34 }
 0x2c2   :  { %v562_v38 = vadd.f32 %v664_v36, %v617_v34 }
 0x2c4   :  { %v641_v39 = vpack.c.bf16 %v562_v38, %v559_v37 }
 0x2c6   :  { %642 = vst [vmem:[%s885_s7] sm:$0xff] %v641_v39  }
 0x2c7   :  { %579 = vsyncpa [#allocation3], 1 }
 0x2c8   :  { %580 = vsyncpa [#allocation5], 1 }

</bundles_post_ra>
